<compile_context>
chip_gen: v6e
topology: v6e:2x2x1
jax: 0.10.0
libtpu: 0.0.40
codegen_flags: <defaults>
</compile_context>

<pallas_src>
import math

import jax
import jax.numpy as jnp
from jax.experimental import pallas as pl
from jax.experimental.pallas import tpu as pltpu

# Config (synthetic, consistent with cfg.FLOW.IN_FEAT / cfg.DATASET.N_CLASS)
IN_FEAT = 32
HIDDEN = 256
N_CLASS = 10
BATCH = 8

_LANE = 128
_NEG_BIG = -1e30  # fills padded class lanes -> exp underflows to exactly 0


def _round_up(x: int, m: int) -> int:
    return ((x + m - 1) // m) * m


def _choose_bm(B: int) -> int:
    """Batch tile: multiple of 8, capped at 256 rows, >=2 grid steps when possible."""
    Bp = _round_up(max(B, 1), 8)
    if Bp <= 8:
        return 8
    # split into at least two tiles (v7x has 2 TCs); cap per-tile rows to bound VMEM
    return min(256, _round_up((Bp + 1) // 2, 8))


def mlp_softmax_kernel(x_ref, w1_ref, b1_ref, w2_ref, b2_ref, o_ref):
    # x_ref: (bm, IN_FEAT) bf16, w1_ref: (IN_FEAT, HIDDEN) bf16, b1_ref: (1, HIDDEN) f32
    # w2_ref: (HIDDEN, 128) bf16 (class axis zero-padded), b2_ref: (1, 128) f32
    #   (padded lanes = -1e30), o_ref: (bm, 128) f32 lane-dense output slab
    x = x_ref[...]

    # linear1 (bf16 operands, f32 accumulate) + bias + (dropout == identity) + relu
    # TODO(synk): training-mode dropout (p=0.3) not implemented; eval semantics only.
    h = jnp.dot(x, w1_ref[...], preferred_element_type=jnp.float32) + b1_ref[...]
    h = jnp.maximum(h, 0.0)

    # linear2 on the 128-wide padded class axis
    logits = jnp.dot(h.astype(w2_ref.dtype), w2_ref[...],
                     preferred_element_type=jnp.float32) + b2_ref[...]

    # numerically-stable softmax along the class axis; padded lanes contribute 0.
    # Exact f32 division keeps row sums at 1.0 to f32 rounding.
    m = jnp.max(logits, axis=-1, keepdims=True)
    e = jnp.exp(logits - m)
    denom = jnp.sum(e, axis=-1, keepdims=True)
    o_ref[...] = (e / denom).astype(o_ref.dtype)


def linear_classifier_forward(x, w1, b1, w2, b2):
    """x: [B, IN_FEAT] float32; returns softmax probs [B, N_CLASS] float32.

    w1: [IN_FEAT, HIDDEN], b1: [1, HIDDEN], w2: [HIDDEN, N_CLASS], b2: [1, N_CLASS]
    (weights stored pre-transposed relative to PyTorch's [out, in]).
    """
    B, in_feat = x.shape
    hidden, n_class = w2.shape

    # --- pad class axis to a lane-dense multiple of 128 ---
    n_pad = _round_up(max(n_class, _LANE), _LANE)
    w2p = jnp.zeros((hidden, n_pad), jnp.bfloat16)
    w2p = w2p.at[:, :n_class].set(w2.astype(jnp.bfloat16))
    b2p = jnp.full((1, n_pad), _NEG_BIG, jnp.float32)
    b2p = b2p.at[:, :n_class].set(b2.reshape(1, n_class).astype(jnp.float32))

    # --- batch tiling, decoupled from B ---
    bm = _choose_bm(B)
    B_pad = _round_up(B, bm)
    xb = x.astype(jnp.bfloat16)
    if B_pad != B:
        xb = jnp.pad(xb, ((0, B_pad - B), (0, 0)))

    w1b = w1.astype(jnp.bfloat16)
    b1f = b1.reshape(1, hidden).astype(jnp.float32)

    grid = (B_pad // bm,)
    flops = 2 * B_pad * (in_feat * hidden + hidden * n_pad)
    bytes_accessed = (xb.size * 2 + w1b.size * 2 + b1f.size * 4
                      + w2p.size * 2 + b2p.size * 4 + B_pad * n_pad * 4)

    out = pl.pallas_call(
        mlp_softmax_kernel,
        out_shape=jax.ShapeDtypeStruct((B_pad, n_pad), jnp.float32),
        grid_spec=pl.GridSpec(
            grid=grid,
            in_specs=[
                pl.BlockSpec((bm, in_feat), lambda i: (i, 0)),      # x tile
                pl.BlockSpec((in_feat, hidden), lambda i: (0, 0)),  # W1 (full)
                pl.BlockSpec((1, hidden), lambda i: (0, 0)),        # b1 (full)
                pl.BlockSpec((hidden, n_pad), lambda i: (0, 0)),    # W2 (padded)
                pl.BlockSpec((1, n_pad), lambda i: (0, 0)),         # b2 (padded)
            ],
            out_specs=pl.BlockSpec((bm, n_pad), lambda i: (i, 0)),
        ),
        compiler_params=pltpu.CompilerParams(
            dimension_semantics=("parallel",),
        ),
        cost_estimate=pl.CostEstimate(
            flops=flops,
            transcendentals=B_pad * n_pad,
            bytes_accessed=bytes_accessed,
        ),
    )(xb, w1b, b1f, w2p, b2p)

    return out[:B, :n_class]


def init_params(key):
    """Deterministic init mimicking nn.Linear defaults (U[-1/sqrt(fan_in), +])."""
    k1, k2, k3, k4 = jax.random.split(key, 4)
    bound1 = 1.0 / math.sqrt(IN_FEAT)
    bound2 = 1.0 / math.sqrt(HIDDEN)
    # stored pre-transposed relative to PyTorch's [out, in] convention
    w1 = jax.random.uniform(k1, (IN_FEAT, HIDDEN), jnp.float32, -bound1, bound1)
    b1 = jax.random.uniform(k2, (1, HIDDEN), jnp.float32, -bound1, bound1)
    w2 = jax.random.uniform(k3, (HIDDEN, N_CLASS), jnp.float32, -bound2, bound2)
    b2 = jax.random.uniform(k4, (1, N_CLASS), jnp.float32, -bound2, bound2)
    return w1, b1, w2, b2


if __name__ == "__main__":
    key = jax.random.PRNGKey(0)
    kx, kp = jax.random.split(key)
    x = jax.random.normal(kx, (BATCH, IN_FEAT), jnp.float32)
    w1, b1, w2, b2 = init_params(kp)

    probs = linear_classifier_forward(x, w1, b1, w2, b2)
    probs = jax.block_until_ready(probs)

    # reference (full f32) for sanity; kernel uses bf16 matmul operands so
    # tolerances are loosened accordingly (normalization itself is exact f32)
    ref = jax.nn.softmax(
        jnp.maximum(x @ w1 + b1, 0.0) @ w2 + b2, axis=-1
    )
    assert probs.shape == (BATCH, N_CLASS)
    assert bool(jnp.all(jnp.isfinite(probs)))
    assert jnp.allclose(jnp.sum(probs, axis=-1), 1.0, atol=1e-3)
    assert jnp.allclose(probs, ref, atol=2e-2)

    print("KERNEL_OK")
</pallas_src>

<mosaic_0001>
module attributes {stable_mosaic.version = 11 : i64} {
  func.func @mlp_softmax_kernel(%arg0: i32, %arg1: memref<8x32xbf16, #tpu.memory_space<vmem>>, %arg2: memref<32x256xbf16, #tpu.memory_space<vmem>>, %arg3: memref<1x256xf32, #tpu.memory_space<vmem>>, %arg4: memref<256x128xbf16, #tpu.memory_space<vmem>>, %arg5: memref<1x128xf32, #tpu.memory_space<vmem>>, %arg6: memref<8x128xf32, #tpu.memory_space<vmem>>) attributes {dimension_semantics = [#tpu.dimension_semantics<parallel>], iteration_bounds = array<i64: 1>, scalar_prefetch = 0 : i64, scratch_operands = 0 : i64, tpu.core_type = #tpu.core_type<tc>, window_params = [{transform_indices = @transform_0, window_bounds = array<i64: 8, 32>}, {pipeline_mode = #tpu.pipeline_mode<synchronous>, transform_indices = @transform_1, window_bounds = array<i64: 32, 256>}, {pipeline_mode = #tpu.pipeline_mode<synchronous>, transform_indices = @transform_2, window_bounds = array<i64: 1, 256>}, {pipeline_mode = #tpu.pipeline_mode<synchronous>, transform_indices = @transform_3, window_bounds = array<i64: 256, 128>}, {pipeline_mode = #tpu.pipeline_mode<synchronous>, transform_indices = @transform_4, window_bounds = array<i64: 1, 128>}, {transform_indices = @transform_5, window_bounds = array<i64: 8, 128>}]} {
    %c0 = arith.constant 0 : index
    %c0_0 = arith.constant 0 : index
    %0 = vector.load %arg1[%c0, %c0_0] : memref<8x32xbf16, #tpu.memory_space<vmem>>, vector<8x32xbf16>
    %c0_1 = arith.constant 0 : index
    %c0_2 = arith.constant 0 : index
    %1 = vector.load %arg2[%c0_1, %c0_2] : memref<32x256xbf16, #tpu.memory_space<vmem>>, vector<32x256xbf16>
    %cst = arith.constant dense<0.000000e+00> : vector<8x256xf32>
    %2 = tpu.matmul %0, %1, %cst {dimension_numbers = #tpu.dot_dimension_numbers<[1], [0], [0], [1], [0, 0, 1, 1], [], []>} : vector<8x32xbf16>, vector<32x256xbf16>, vector<8x256xf32> -> vector<8x256xf32>
    %c0_3 = arith.constant 0 : index
    %c0_4 = arith.constant 0 : index
    %3 = vector.load %arg3[%c0_3, %c0_4] : memref<1x256xf32, #tpu.memory_space<vmem>>, vector<1x256xf32>
    %4 = vector.broadcast %3 : vector<1x256xf32> to vector<8x256xf32>
    %5 = arith.addf %2, %4 : vector<8x256xf32>
    %cst_5 = arith.constant 0.000000e+00 : f32
    %6 = vector.broadcast %cst_5 : f32 to vector<8x256xf32>
    %7 = arith.maximumf %5, %6 : vector<8x256xf32>
    %8 = arith.truncf %7 : vector<8x256xf32> to vector<8x256xbf16>
    %c0_6 = arith.constant 0 : index
    %c0_7 = arith.constant 0 : index
    %9 = vector.load %arg4[%c0_6, %c0_7] : memref<256x128xbf16, #tpu.memory_space<vmem>>, vector<256x128xbf16>
    %cst_8 = arith.constant dense<0.000000e+00> : vector<8x128xf32>
    %10 = tpu.matmul %8, %9, %cst_8 {dimension_numbers = #tpu.dot_dimension_numbers<[1], [0], [0], [1], [0, 0, 1, 1], [], []>} : vector<8x256xbf16>, vector<256x128xbf16>, vector<8x128xf32> -> vector<8x128xf32>
    %c0_9 = arith.constant 0 : index
    %c0_10 = arith.constant 0 : index
    %11 = vector.load %arg5[%c0_9, %c0_10] : memref<1x128xf32, #tpu.memory_space<vmem>>, vector<1x128xf32>
    %12 = vector.broadcast %11 : vector<1x128xf32> to vector<8x128xf32>
    %13 = arith.addf %10, %12 : vector<8x128xf32>
    %cst_11 = arith.constant dense<0xFF800000> : vector<8xf32>
    %14 = vector.multi_reduction <maximumf>, %13, %cst_11 [1] : vector<8x128xf32> to vector<8xf32>
    %15 = vector.shape_cast %14 : vector<8xf32> to vector<8x1xf32>
    %16 = vector.broadcast %15 : vector<8x1xf32> to vector<8x128xf32>
    %17 = arith.subf %13, %16 : vector<8x128xf32>
    %18 = math.exp %17 : vector<8x128xf32>
    %cst_12 = arith.constant dense<0.000000e+00> : vector<8xf32>
    %19 = vector.multi_reduction <add>, %18, %cst_12 [1] : vector<8x128xf32> to vector<8xf32>
    %20 = vector.shape_cast %19 : vector<8xf32> to vector<8x1xf32>
    %21 = vector.broadcast %20 : vector<8x1xf32> to vector<8x128xf32>
    %22 = arith.divf %18, %21 : vector<8x128xf32>
    %c0_13 = arith.constant 0 : index
    %c0_14 = arith.constant 0 : index
    %23 = vector.load %arg6[%c0_13, %c0_14] : memref<8x128xf32, #tpu.memory_space<vmem>>, vector<8x128xf32>
    tpu.vector_store %arg6[%c0_13, %c0_14], %22 {strides = array<i32>} : memref<8x128xf32, #tpu.memory_space<vmem>>, vector<8x128xf32>,
    return
  }
  func.func @transform_0(%arg0: i32) -> (i32, i32) {
    %c0_i32 = arith.constant 0 : i32
    %c0_i32_0 = arith.constant 0 : i32
    return %arg0, %c0_i32 : i32, i32
  }
  func.func @transform_1(%arg0: i32) -> (i32, i32) {
    %c0_i32 = arith.constant 0 : i32
    %c0_i32_0 = arith.constant 0 : i32
    %c0_i32_1 = arith.constant 0 : i32
    return %c0_i32, %c0_i32_0 : i32, i32
  }
  func.func @transform_2(%arg0: i32) -> (i32, i32) {
    %c0_i32 = arith.constant 0 : i32
    %c0_i32_0 = arith.constant 0 : i32
    %c0_i32_1 = arith.constant 0 : i32
    return %c0_i32, %c0_i32_0 : i32, i32
  }
  func.func @transform_3(%arg0: i32) -> (i32, i32) {
    %c0_i32 = arith.constant 0 : i32
    %c0_i32_0 = arith.constant 0 : i32
    %c0_i32_1 = arith.constant 0 : i32
    return %c0_i32, %c0_i32_0 : i32, i32
  }
  func.func @transform_4(%arg0: i32) -> (i32, i32) {
    %c0_i32 = arith.constant 0 : i32
    %c0_i32_0 = arith.constant 0 : i32
    %c0_i32_1 = arith.constant 0 : i32
    return %c0_i32, %c0_i32_0 : i32, i32
  }
  func.func @transform_5(%arg0: i32) -> (i32, i32) {
    %c0_i32 = arith.constant 0 : i32
    %c0_i32_0 = arith.constant 0 : i32
    return %arg0, %c0_i32 : i32, i32
  }
}

</mosaic_0001>

<bundles_post_ra>
// kernel: tpu_custom_call.1
= control target key start
LH: loop header
LB: loop body
LE: loop exit
PB: predicated region body
PF: predicated region fallthrough
CT: control target
= control target key end

     0   :  { %10 = vsyncpa [#allocation3], 0  ;;  %s570_s0 = inlined_call_operand.hbm [shape: bf16[8,32], index: 0, kind: input, shape index: {}]   ;;  %s571_s1 = inlined_call_operand.hbm [shape: bf16[32,256], index: 1, kind: input, shape index: {}]   ;;  %s572_s2 = inlined_call_operand.vmem [shape: f32[1,256], index: 2, kind: input, shape index: {}]   ;;  %s573_s3 = inlined_call_operand.hbm [shape: bf16[256,128], index: 3, kind: input, shape index: {}]   ;;  %s574_s4 = inlined_call_operand.vmem [shape: f32[1,128], index: 4, kind: input, shape index: {}]   ;;  %s575_s5 = inlined_call_operand.hbm [shape: f32[8,128], index: 5, kind: output, shape index: {}]  }
   0x1   :  { %11 = vsyncpa [#allocation6], 0 }
   0x2   :  { %12 = vsyncpa [#allocation4], 0  ;;  %s513_s18 = smov [#allocation5]  }
   0x3   :  { %s28_s19 = sshll.u32 %s513_s18, 4  ;;  %s29_s19 = int_to_ptr.vmem [resolvable:$true] %s28_s19 }
   0x4   :  { %s435_s20 = scalar_lea.vmem %s29_s19, 512  ;;  %p440_p1 = scmp.lt.s32.totalorder %s29_s19, %s29_s19 }
   0x5   :  { %p436_p0 = scmp.ne.s32.totalorder %s29_s19, %s435_s20  ;;  %p441_p2 = scmp.lt.s32.totalorder %s435_s20, %s435_s20 }
   0x7   :  { %p442_p3 = por %p441_p2, %p440_p1 }
   0x9   :  { %p443_p4 = pnand %p442_p3, %p436_p0 }
   0xb   :  { %446 = shalt.err (!%p443_p4)
}
   0xc   :  { %s514_s21 = smov 128   ;;  %s515_s22 = smov 8  }
   0xd   :  { %34 = dma.hbm_to_vmem [thread:$0]  %s571_s1, 512, %s29_s19, [#allocation6], %s514_s21, %s514_s21, %s515_s22  }
   0xe   :  { %s516_s25 = smov [#allocation2]   ;;  %s517_s27 = smov [#allocation7]  }
   0xf   :  { %s19_s26 = sshll.u32 %s516_s25, 4  ;;  %s42_s28 = sshll.u32 %s517_s27, 4  ;;  %s20_s26 = int_to_ptr.vmem [resolvable:$true] %s19_s26  ;;  %s43_s28 = int_to_ptr.vmem [resolvable:$true] %s42_s28 }
  0x10   :  { %s455_s29 = scalar_lea.vmem %s20_s26, 64  ;;  %p460_p6 = scmp.lt.s32.totalorder %s20_s26, %s20_s26 }
  0x11   :  { %p456_p5 = scmp.ne.s32.totalorder %s20_s26, %s455_s29  ;;  %p461_p7 = scmp.lt.s32.totalorder %s455_s29, %s455_s29 }
  0x13   :  { %p462_p8 = por %p461_p7, %p460_p6 }
  0x15   :  { %p463_p9 = pnand %p462_p8, %p456_p5 }
  0x17   :  { %466 = shalt.err (!%p463_p9)
}
  0x18   :  { %22 = dma.hbm_to_vmem [thread:$0]  %s570_s0, 64, %s20_s26, [#allocation3]  }
  0x19   :  { %s475_s7 = scalar_lea.vmem %s43_s28, 2048  ;;  %p480_p11 = scmp.lt.s32.totalorder %s43_s28, %s43_s28 }
  0x1a   :  { %p476_p10 = scmp.ne.s32.totalorder %s43_s28, %s475_s7  ;;  %p481_p12 = scmp.lt.s32.totalorder %s475_s7, %s475_s7 }
  0x1c   :  { %p482_p13 = por %p481_p12, %p480_p11 }
  0x1e   :  { %p483_p0 = pnand %p482_p13, %p476_p10 }
  0x20   :  { %486 = shalt.err (!%p483_p0)
}
  0x21   :  { %s518_s1 = smov 64   ;;  %s519_s8 = smov 4  }
  0x22   :  { %48 = dma.hbm_to_vmem [thread:$0]  %s573_s3, 2048, %s43_s28, [#allocation6], %s518_s1, %s518_s1, %s519_s8  }
  0x23   :  { %507 = dma.done.wait [#allocation3], 64  }
  0x24   :  { %508 = vsyncadd [#allocation3], 4294967232 }
  0x25   :  { %509 = dma.done.wait [#allocation6], 2560  }
  0x26   :  { %510 = vsyncadd [#allocation6], 4294964736  ;;  %v520_v0 = vmov 0   ;;  %v401_v1 = vld [vmem:[#allocation5 + $0x14] ss:$8 sps:$4 sm:$0xff]   ;;  %vm98_vm0 = vcmask 261120   ;;  %v68_v22 = vlaneseq }
  0x27   :  { %134 = vmatprep.mubr.bf16.mxu0 %v520_v0  ;;  %v403_v2 = vld [vmem:[#allocation5 + $0x10] ss:$8 sps:$4 sm:$0xff]   ;;  %114 = vmatprep.subr.bf16.mxu0 %v401_v1  ;;  %v404_v3 = vld [vmem:[#allocation5 + $0x4] ss:$8 sps:$4 sm:$0xff]   ;;  %v406_v4 = vld [vmem:[#allocation5] ss:$8 sps:$4 sm:$0xff]  }
  0x28   :  { %115 = vmatpush1.bf16.msra.mxu0 %v403_v2  ;;  %v407_v5 = vld [vmem:[#allocation7 + $0x78] sm:$0xff]   ;;  %v409_v8 = vld [vmem:[#allocation7 + $0x70] sm:$0xff]   ;;  %v411_v10 = vld [vmem:[#allocation7 + $0x68] sm:$0xff]   ;;  %v69_v23 = vshrl.u32 %v68_v22, 7 }
  0x29   :  { %116 = vmatprep.subr.bf16.mxu0 %v404_v3  ;;  %v408_v6 = vld [vmem:[#allocation7 + $0x38] sm:$0xff]   ;;  %370 = vmatprep.subr.bf16.mxu1 %v407_v5  ;;  %v410_v9 = vld [vmem:[#allocation7 + $0x30] sm:$0xff]   ;;  %v412_v11 = vld [vmem:[#allocation7 + $0x28] sm:$0xff]  }
  0x2a   :  { %v61_v7 = vld [vmem:[#allocation2] sm:$0xf]  ;;  %371 = vmatpush3.bf16.msra.mxu1 %v408_v6  ;;  %v413_v12 = vld [vmem:[#allocation7 + $0x60] sm:$0xff]   ;;  %v417_v16 = vld [vmem:[#allocation7 + $0x50] sm:$0xff]   ;;  %v70_v24 = vsub.s32 0, %v69_v23  ;;  %v74_v26 = vsub.s32 1, %v69_v23 }
  0x2b   :  { %372 = vmatprep.subr.bf16.mxu1 %v409_v8  ;;  %v414_v13 = vld [vmem:[#allocation7 + $0x20] sm:$0xff]   ;;  %v415_v14 = vld [vmem:[#allocation7 + $0x58] sm:$0xff]   ;;  %v418_v17 = vld [vmem:[#allocation7 + $0x10] sm:$0xff]  }
  0x2c   :  { %117 = vmatpush1.bf16.msra.mxu0 %v406_v4  ;;  %v416_v15 = vld [vmem:[#allocation7 + $0x18] sm:$0xff]   ;;  %v419_v18 = vld [vmem:[#allocation7 + $0x48] sm:$0xff]   ;;  %v421_v20 = vld [vmem:[#allocation7 + $0x40] sm:$0xff]  }
  0x2d   :  { %v420_v19 = vld [vmem:[#allocation7 + $0x8] sm:$0xff]   ;;  %v422_v21 = vld [vmem:[#allocation7] sm:$0xff]   ;;  %v66_v25 = vld [vmem:[%s572_s2] sm:$0x3]  ;;  %s521_s2 = smov [#allocation8]  }
  0x2e   :  { %373 = vmatpush3.bf16.msra.mxu1 %v410_v9  ;;  %v71_v27 = vrot.slane %v66_v25, %v70_v24  ;;  %v75_v28 = vrot.slane %v66_v25, %v74_v26  ;;  %v353_v41 = vld [vmem:[%s574_s4] ss:$0 sm:$0xff]  ;;  %s338_s13 = sshll.u32 %s521_s2, 4  ;;  %s339_s13 = int_to_ptr.vmem [resolvable:$true] %s338_s13 }
  0x2f   :  { %352 = vmatmul.mubr.msk.bf16.vlgmr.msra.gmra.mxu0 %vm98_vm0, %v61_v7  ;;  %374 = vmatprep.subr.bf16.mxu1 %v411_v10  ;;  %s487_s4 = scalar_lea.vmem %s339_s13, 128  ;;  %p492_p2 = scmp.lt.s32.totalorder %s339_s13, %s339_s13 }
  0x30   :  { %p488_p1 = scmp.ne.s32.totalorder %s339_s13, %s487_s4  ;;  %p493_p3 = scmp.lt.s32.totalorder %s487_s4, %s487_s4 }
  0x32   :  { %375 = vmatpush3.bf16.msra.mxu1 %v412_v11  ;;  %p494_p4 = por %p493_p3, %p492_p2 }
  0x33   :  { %376 = vmatprep.subr.bf16.mxu1 %v413_v12 }
  0x34   :  { %p495_p5 = pnand %p494_p4, %p488_p1 }
  0x36   :  { %377 = vmatpush3.bf16.msra.mxu1 %v414_v13 }
  0x37   :  { %378 = vmatprep.subr.bf16.mxu1 %v415_v14 }
  0x3a   :  { %379 = vmatpush3.bf16.msra.mxu1 %v416_v15 }
  0x3b   :  { %380 = vmatprep.subr.bf16.mxu1 %v417_v16 }
  0x3e   :  { %381 = vmatpush3.bf16.msra.mxu1 %v418_v17 }
  0x3f   :  { %382 = vmatprep.subr.bf16.mxu1 %v419_v18 }
  0x42   :  { %383 = vmatpush3.bf16.msra.mxu1 %v420_v19 }
  0x43   :  { %384 = vmatprep.subr.bf16.mxu1 %v421_v20 }
  0x46   :  { %385 = vmatpush3.bf16.msra.mxu1 %v422_v21 }
  0xef   :  { %v136_v29 = vpop.f32.mrf.mxu0 }
  0xf0   :  { %v137_v30 = vadd.f32 %v136_v29, %v71_v27 }
  0xf1   :  { %v138_v31 = vpop.f32.mrf.mxu0 }
  0xf2   :  { %v139_v32 = vadd.f32 %v138_v31, %v75_v28  ;;  %v143_v33 = vmax.f32 %v137_v30, 0.0 }
  0xf3   :  { %v140_v34 = vpop.f32.mrf.mxu0 }
  0xf4   :  { %v144_v35 = vmax.f32 %v139_v32, 0.0  ;;  %v145_v38 = vpack.c.bf16 %v143_v33, %v143_v33 }
  0xf5   :  { %v141_v36 = vpop.f32.mrf.mxu0 }
  0xf6   :  { %v146_v37 = vpack.c.bf16 %v144_v35, %v144_v35 }
  0xf8   :  { %314 = vmatprep.mubr.bf16.mxu1 %v146_v37 }
  0xf9   :  { %315 = vmatmul.mubr.bf16.vlgmr.msra.gmra.mxu1 %v145_v38 }
 0x1b9   :  { %v386_v39 = vpop.f32.mrf.mxu1 }
 0x1bb   :  { %v387_v40 = vpop.f32.mrf.mxu1 }
 0x1bc   :  { %v388_v42 = vadd.f32 %v387_v40, %v386_v39 }
 0x1bd   :  { %v389_v43 = vpop.f32.mrf.mxu1 }
 0x1be   :  { %v317_v44 = vadd.f32 %v388_v42, %v353_v41 }
 0x1bf   :  { %v390_v45 = vpop.f32.mrf.mxu1 }
 0x1c0   :  { %322 = vmax.xlane.f32.xlu0 %v317_v44 }
 0x249   :  { %v323_v46 = vpop.xlane.xlu0 %322 }
 0x24a   :  { %v324_v47 = vsub.f32 %v317_v44, %v323_v46 }
 0x24c   :  { %v325_v48 = vmul.f32 1.442695, %v324_v47 }
 0x24e   :  { %423 = vpow2.f32 %v325_v48 }
 0x25b   :  { %v424_v49 = vpop.eup %423 }
 0x25c   :  { %327 = vadd.xlane.f32.xlu0 %v424_v49 }
 0x2e5   :  { %v328_v50 = vpop.xlane.xlu0 %327 }
 0x2e6   :  { %425 = vrcp.f32 %v328_v50 }
 0x2f3   :  { %v426_v51 = vpop.eup %425 }
 0x2f4   :  { %v330_v52 = vmul.f32 %v426_v51, %v424_v49 }
 0x2f6   :  { %331 = vst [vmem:[#allocation8] sm:$0xff] %v330_v52 }
 0x2f7   :  { %498 = shalt.err (!%p495_p5)
}
 0x2f8   :  { %341 = dma.vmem_to_hbm [thread:$0]  %s339_s13, 128, %s575_s5, [#allocation4]  }
 0x2f9   :  { %511 = dma.done.wait [#allocation4], 128  }
 0x2fa   :  { %512 = vsyncadd [#allocation4], 4294967168 }
 0x2fb   :  { %345 = vsyncpa [#allocation3], 1 }
 0x2fc   :  { %346 = vsyncpa [#allocation6], 1 }
 0x2fd   :  { %347 = vsyncpa [#allocation4], 1 }

</bundles_post_ra>
